<compile_context>
chip_gen: v7x
topology: tpu7x:2x2x1
jax: 0.10.0
libtpu: 0.0.40
codegen_flags: <defaults>
</compile_context>

<pallas_src>
import jax
import jax.numpy as jnp
from jax.experimental import pallas as pl
from jax.experimental.pallas import tpu as pltpu

LANES = 128  # lane width of a vreg


def mlp_kernel(params_ref, x_ref, o_ref):
    """VPU-only MLP forward on one batch tile.

    params_ref: SMEM (41,) f32 = [w1 (10x2 row-major) | b1 (10) | w2 (10) | b2 (1)]
    x_ref     : VMEM (2, TR, 128)  -- feature plane 0 / 1, batch on (sublane, lane)
    o_ref     : VMEM (TR, 128)     -- lane-dense output tile
    """
    x0 = x_ref[0]  # (TR, 128)
    x1 = x_ref[1]  # (TR, 128)

    b2 = params_ref[40]
    acc = jnp.zeros(o_ref.shape, jnp.float32) + b2

    # Unrolled over the 10 hidden units: ~5 VPU ops each, co-issued in the
    # vector-ALU slots; effectively free under the HBM DMA.
    for j in range(10):
        w1_j0 = params_ref[2 * j]       # w1[j, 0]
        w1_j1 = params_ref[2 * j + 1]   # w1[j, 1]
        b1_j = params_ref[20 + j]       # b1[j]
        w2_j = params_ref[30 + j]       # w2[0, j]
        h = x0 * w1_j0 + x1 * w1_j1 + b1_j
        h = jnp.maximum(h, 0.0)         # ReLU
        acc = acc + h * w2_j

    o_ref[...] = acc


def my_neural_network(x, w1, b1, w2, b2, *, max_block_rows=256):
    """Forward pass of MyNeuralNetwork.

    x : (B, 2) float32 (PyTorch nn.Linear input layout)
    w1: (10, 2), b1: (10,)  -- Linear(2, 10)
    w2: (1, 10), b2: (1,)   -- Linear(10, 1)
    returns (B, 1) float32
    """
    B = x.shape[0]

    # ---- layout plumbing (plain JAX glue) --------------------------------
    # Batch -> (rows, 128); pad rows up to a multiple of the tile rows.
    rows = -(-B // LANES)                       # ceil(B / 128)
    tr = min(max_block_rows, 8 * (-(-rows // 8)))  # tile rows, multiple of 8
    rows_p = tr * (-(-rows // tr))
    Bp = rows_p * LANES

    x = x.astype(jnp.float32)
    x_pad = jnp.zeros((Bp, 2), jnp.float32).at[:B].set(x)
    x_lanes = x_pad.T.reshape(2, rows_p, LANES)  # (2, rows_p, 128), lane-dense

    # Pack all parameters into one 41-element f32 slab for a single SMEM copy.
    params = jnp.concatenate(
        [
            w1.reshape(-1).astype(jnp.float32),  # 20
            b1.reshape(-1).astype(jnp.float32),  # 10
            w2.reshape(-1).astype(jnp.float32),  # 10
            b2.reshape(-1).astype(jnp.float32),  # 1
        ]
    )

    out_tiles = pl.pallas_call(
        mlp_kernel,
        out_shape=jax.ShapeDtypeStruct((rows_p, LANES), jnp.float32),
        grid=(rows_p // tr,),
        in_specs=[
            # whole parameter slab, resident in SMEM for the whole grid
            pl.BlockSpec(memory_space=pltpu.MemorySpace.SMEM),
            # x tile: (2, tr, 128) -- auto double-buffered over the batch grid
            pl.BlockSpec((2, tr, LANES), lambda i: (0, i, 0)),
        ],
        out_specs=pl.BlockSpec((tr, LANES), lambda i: (i, 0)),
        compiler_params=pltpu.CompilerParams(
            dimension_semantics=("parallel",),
        ),
    )(params, x_lanes)

    # (rows_p, 128) -> (Bp,) -> (B, 1)
    return out_tiles.reshape(-1)[:B].reshape(B, 1)


def init_params(key):
    """Mirror PyTorch nn.Linear default init: U(-1/sqrt(fan_in), +1/sqrt(fan_in))."""
    k1, k2, k3, k4 = jax.random.split(key, 4)
    bound1 = 1.0 / jnp.sqrt(2.0)    # fan_in = 2
    bound2 = 1.0 / jnp.sqrt(10.0)   # fan_in = 10
    w1 = jax.random.uniform(k1, (10, 2), jnp.float32, -bound1, bound1)
    b1 = jax.random.uniform(k2, (10,), jnp.float32, -bound1, bound1)
    w2 = jax.random.uniform(k3, (1, 10), jnp.float32, -bound2, bound2)
    b2 = jax.random.uniform(k4, (1,), jnp.float32, -bound2, bound2)
    return w1, b1, w2, b2


if __name__ == "__main__":
    key = jax.random.PRNGKey(0)
    key_x, key_p = jax.random.split(key)

    B = 8
    x = jax.random.normal(key_x, (B, 2), jnp.float32)
    w1, b1, w2, b2 = init_params(key_p)

    out = my_neural_network(x, w1, b1, w2, b2)
    out = jax.block_until_ready(out)

    # Pure-JAX reference check of the forward pass.
    ref = jnp.maximum(x @ w1.T + b1, 0.0) @ w2.T + b2
    assert out.shape == (B, 1)
    assert jnp.allclose(out, ref, atol=1e-5, rtol=1e-5)

    print("KERNEL_OK")
</pallas_src>

<mosaic_0001>
module attributes {stable_mosaic.version = 11 : i64} {
  func.func @mlp_kernel(%arg0: i32, %arg1: memref<41xf32, #tpu.memory_space<smem>>, %arg2: memref<2x8x128xf32, #tpu.memory_space<vmem>>, %arg3: memref<8x128xf32, #tpu.memory_space<vmem>>) attributes {dimension_semantics = [#tpu.dimension_semantics<parallel>], iteration_bounds = array<i64: 1>, scalar_prefetch = 0 : i64, scratch_operands = 0 : i64, tpu.core_type = #tpu.core_type<tc>, window_params = [{transform_indices = @transform_0, window_bounds = array<i64: 41>}, {transform_indices = @transform_1, window_bounds = array<i64: 2, 8, 128>}, {transform_indices = @transform_2, window_bounds = array<i64: 8, 128>}]} {
    %c0 = arith.constant 0 : index
    %c0_0 = arith.constant 0 : index
    %c0_1 = arith.constant 0 : index
    %0 = vector.load %arg2[%c0, %c0_0, %c0_1] : memref<2x8x128xf32, #tpu.memory_space<vmem>>, vector<1x8x128xf32>
    %1 = vector.shape_cast %0 : vector<1x8x128xf32> to vector<8x128xf32>
    %c1 = arith.constant 1 : index
    %c0_2 = arith.constant 0 : index
    %c0_3 = arith.constant 0 : index
    %2 = vector.load %arg2[%c1, %c0_2, %c0_3] : memref<2x8x128xf32, #tpu.memory_space<vmem>>, vector<1x8x128xf32>
    %3 = vector.shape_cast %2 : vector<1x8x128xf32> to vector<8x128xf32>
    %c40 = arith.constant 40 : index
    %4 = memref.load %arg1[%c40] : memref<41xf32, #tpu.memory_space<smem>>
    %cst = arith.constant 0.000000e+00 : f32
    %5 = vector.broadcast %cst : f32 to vector<8x128xf32>
    %6 = vector.broadcast %4 : f32 to vector<8x128xf32>
    %7 = arith.addf %5, %6 : vector<8x128xf32>
    %c0_4 = arith.constant 0 : index
    %8 = memref.load %arg1[%c0_4] : memref<41xf32, #tpu.memory_space<smem>>
    %c1_5 = arith.constant 1 : index
    %9 = memref.load %arg1[%c1_5] : memref<41xf32, #tpu.memory_space<smem>>
    %c20 = arith.constant 20 : index
    %10 = memref.load %arg1[%c20] : memref<41xf32, #tpu.memory_space<smem>>
    %c30 = arith.constant 30 : index
    %11 = memref.load %arg1[%c30] : memref<41xf32, #tpu.memory_space<smem>>
    %12 = vector.broadcast %8 : f32 to vector<8x128xf32>
    %13 = arith.mulf %1, %12 : vector<8x128xf32>
    %14 = vector.broadcast %9 : f32 to vector<8x128xf32>
    %15 = arith.mulf %3, %14 : vector<8x128xf32>
    %16 = arith.addf %13, %15 : vector<8x128xf32>
    %17 = vector.broadcast %10 : f32 to vector<8x128xf32>
    %18 = arith.addf %16, %17 : vector<8x128xf32>
    %cst_6 = arith.constant 0.000000e+00 : f32
    %19 = vector.broadcast %cst_6 : f32 to vector<8x128xf32>
    %20 = arith.maximumf %18, %19 : vector<8x128xf32>
    %21 = vector.broadcast %11 : f32 to vector<8x128xf32>
    %22 = arith.mulf %20, %21 : vector<8x128xf32>
    %23 = arith.addf %7, %22 : vector<8x128xf32>
    %c2 = arith.constant 2 : index
    %24 = memref.load %arg1[%c2] : memref<41xf32, #tpu.memory_space<smem>>
    %c3 = arith.constant 3 : index
    %25 = memref.load %arg1[%c3] : memref<41xf32, #tpu.memory_space<smem>>
    %c21 = arith.constant 21 : index
    %26 = memref.load %arg1[%c21] : memref<41xf32, #tpu.memory_space<smem>>
    %c31 = arith.constant 31 : index
    %27 = memref.load %arg1[%c31] : memref<41xf32, #tpu.memory_space<smem>>
    %28 = vector.broadcast %24 : f32 to vector<8x128xf32>
    %29 = arith.mulf %1, %28 : vector<8x128xf32>
    %30 = vector.broadcast %25 : f32 to vector<8x128xf32>
    %31 = arith.mulf %3, %30 : vector<8x128xf32>
    %32 = arith.addf %29, %31 : vector<8x128xf32>
    %33 = vector.broadcast %26 : f32 to vector<8x128xf32>
    %34 = arith.addf %32, %33 : vector<8x128xf32>
    %cst_7 = arith.constant 0.000000e+00 : f32
    %35 = vector.broadcast %cst_7 : f32 to vector<8x128xf32>
    %36 = arith.maximumf %34, %35 : vector<8x128xf32>
    %37 = vector.broadcast %27 : f32 to vector<8x128xf32>
    %38 = arith.mulf %36, %37 : vector<8x128xf32>
    %39 = arith.addf %23, %38 : vector<8x128xf32>
    %c4 = arith.constant 4 : index
    %40 = memref.load %arg1[%c4] : memref<41xf32, #tpu.memory_space<smem>>
    %c5 = arith.constant 5 : index
    %41 = memref.load %arg1[%c5] : memref<41xf32, #tpu.memory_space<smem>>
    %c22 = arith.constant 22 : index
    %42 = memref.load %arg1[%c22] : memref<41xf32, #tpu.memory_space<smem>>
    %c32 = arith.constant 32 : index
    %43 = memref.load %arg1[%c32] : memref<41xf32, #tpu.memory_space<smem>>
    %44 = vector.broadcast %40 : f32 to vector<8x128xf32>
    %45 = arith.mulf %1, %44 : vector<8x128xf32>
    %46 = vector.broadcast %41 : f32 to vector<8x128xf32>
    %47 = arith.mulf %3, %46 : vector<8x128xf32>
    %48 = arith.addf %45, %47 : vector<8x128xf32>
    %49 = vector.broadcast %42 : f32 to vector<8x128xf32>
    %50 = arith.addf %48, %49 : vector<8x128xf32>
    %cst_8 = arith.constant 0.000000e+00 : f32
    %51 = vector.broadcast %cst_8 : f32 to vector<8x128xf32>
    %52 = arith.maximumf %50, %51 : vector<8x128xf32>
    %53 = vector.broadcast %43 : f32 to vector<8x128xf32>
    %54 = arith.mulf %52, %53 : vector<8x128xf32>
    %55 = arith.addf %39, %54 : vector<8x128xf32>
    %c6 = arith.constant 6 : index
    %56 = memref.load %arg1[%c6] : memref<41xf32, #tpu.memory_space<smem>>
    %c7 = arith.constant 7 : index
    %57 = memref.load %arg1[%c7] : memref<41xf32, #tpu.memory_space<smem>>
    %c23 = arith.constant 23 : index
    %58 = memref.load %arg1[%c23] : memref<41xf32, #tpu.memory_space<smem>>
    %c33 = arith.constant 33 : index
    %59 = memref.load %arg1[%c33] : memref<41xf32, #tpu.memory_space<smem>>
    %60 = vector.broadcast %56 : f32 to vector<8x128xf32>
    %61 = arith.mulf %1, %60 : vector<8x128xf32>
    %62 = vector.broadcast %57 : f32 to vector<8x128xf32>
    %63 = arith.mulf %3, %62 : vector<8x128xf32>
    %64 = arith.addf %61, %63 : vector<8x128xf32>
    %65 = vector.broadcast %58 : f32 to vector<8x128xf32>
    %66 = arith.addf %64, %65 : vector<8x128xf32>
    %cst_9 = arith.constant 0.000000e+00 : f32
    %67 = vector.broadcast %cst_9 : f32 to vector<8x128xf32>
    %68 = arith.maximumf %66, %67 : vector<8x128xf32>
    %69 = vector.broadcast %59 : f32 to vector<8x128xf32>
    %70 = arith.mulf %68, %69 : vector<8x128xf32>
    %71 = arith.addf %55, %70 : vector<8x128xf32>
    %c8 = arith.constant 8 : index
    %72 = memref.load %arg1[%c8] : memref<41xf32, #tpu.memory_space<smem>>
    %c9 = arith.constant 9 : index
    %73 = memref.load %arg1[%c9] : memref<41xf32, #tpu.memory_space<smem>>
    %c24 = arith.constant 24 : index
    %74 = memref.load %arg1[%c24] : memref<41xf32, #tpu.memory_space<smem>>
    %c34 = arith.constant 34 : index
    %75 = memref.load %arg1[%c34] : memref<41xf32, #tpu.memory_space<smem>>
    %76 = vector.broadcast %72 : f32 to vector<8x128xf32>
    %77 = arith.mulf %1, %76 : vector<8x128xf32>
    %78 = vector.broadcast %73 : f32 to vector<8x128xf32>
    %79 = arith.mulf %3, %78 : vector<8x128xf32>
    %80 = arith.addf %77, %79 : vector<8x128xf32>
    %81 = vector.broadcast %74 : f32 to vector<8x128xf32>
    %82 = arith.addf %80, %81 : vector<8x128xf32>
    %cst_10 = arith.constant 0.000000e+00 : f32
    %83 = vector.broadcast %cst_10 : f32 to vector<8x128xf32>
    %84 = arith.maximumf %82, %83 : vector<8x128xf32>
    %85 = vector.broadcast %75 : f32 to vector<8x128xf32>
    %86 = arith.mulf %84, %85 : vector<8x128xf32>
    %87 = arith.addf %71, %86 : vector<8x128xf32>
    %c10 = arith.constant 10 : index
    %88 = memref.load %arg1[%c10] : memref<41xf32, #tpu.memory_space<smem>>
    %c11 = arith.constant 11 : index
    %89 = memref.load %arg1[%c11] : memref<41xf32, #tpu.memory_space<smem>>
    %c25 = arith.constant 25 : index
    %90 = memref.load %arg1[%c25] : memref<41xf32, #tpu.memory_space<smem>>
    %c35 = arith.constant 35 : index
    %91 = memref.load %arg1[%c35] : memref<41xf32, #tpu.memory_space<smem>>
    %92 = vector.broadcast %88 : f32 to vector<8x128xf32>
    %93 = arith.mulf %1, %92 : vector<8x128xf32>
    %94 = vector.broadcast %89 : f32 to vector<8x128xf32>
    %95 = arith.mulf %3, %94 : vector<8x128xf32>
    %96 = arith.addf %93, %95 : vector<8x128xf32>
    %97 = vector.broadcast %90 : f32 to vector<8x128xf32>
    %98 = arith.addf %96, %97 : vector<8x128xf32>
    %cst_11 = arith.constant 0.000000e+00 : f32
    %99 = vector.broadcast %cst_11 : f32 to vector<8x128xf32>
    %100 = arith.maximumf %98, %99 : vector<8x128xf32>
    %101 = vector.broadcast %91 : f32 to vector<8x128xf32>
    %102 = arith.mulf %100, %101 : vector<8x128xf32>
    %103 = arith.addf %87, %102 : vector<8x128xf32>
    %c12 = arith.constant 12 : index
    %104 = memref.load %arg1[%c12] : memref<41xf32, #tpu.memory_space<smem>>
    %c13 = arith.constant 13 : index
    %105 = memref.load %arg1[%c13] : memref<41xf32, #tpu.memory_space<smem>>
    %c26 = arith.constant 26 : index
    %106 = memref.load %arg1[%c26] : memref<41xf32, #tpu.memory_space<smem>>
    %c36 = arith.constant 36 : index
    %107 = memref.load %arg1[%c36] : memref<41xf32, #tpu.memory_space<smem>>
    %108 = vector.broadcast %104 : f32 to vector<8x128xf32>
    %109 = arith.mulf %1, %108 : vector<8x128xf32>
    %110 = vector.broadcast %105 : f32 to vector<8x128xf32>
    %111 = arith.mulf %3, %110 : vector<8x128xf32>
    %112 = arith.addf %109, %111 : vector<8x128xf32>
    %113 = vector.broadcast %106 : f32 to vector<8x128xf32>
    %114 = arith.addf %112, %113 : vector<8x128xf32>
    %cst_12 = arith.constant 0.000000e+00 : f32
    %115 = vector.broadcast %cst_12 : f32 to vector<8x128xf32>
    %116 = arith.maximumf %114, %115 : vector<8x128xf32>
    %117 = vector.broadcast %107 : f32 to vector<8x128xf32>
    %118 = arith.mulf %116, %117 : vector<8x128xf32>
    %119 = arith.addf %103, %118 : vector<8x128xf32>
    %c14 = arith.constant 14 : index
    %120 = memref.load %arg1[%c14] : memref<41xf32, #tpu.memory_space<smem>>
    %c15 = arith.constant 15 : index
    %121 = memref.load %arg1[%c15] : memref<41xf32, #tpu.memory_space<smem>>
    %c27 = arith.constant 27 : index
    %122 = memref.load %arg1[%c27] : memref<41xf32, #tpu.memory_space<smem>>
    %c37 = arith.constant 37 : index
    %123 = memref.load %arg1[%c37] : memref<41xf32, #tpu.memory_space<smem>>
    %124 = vector.broadcast %120 : f32 to vector<8x128xf32>
    %125 = arith.mulf %1, %124 : vector<8x128xf32>
    %126 = vector.broadcast %121 : f32 to vector<8x128xf32>
    %127 = arith.mulf %3, %126 : vector<8x128xf32>
    %128 = arith.addf %125, %127 : vector<8x128xf32>
    %129 = vector.broadcast %122 : f32 to vector<8x128xf32>
    %130 = arith.addf %128, %129 : vector<8x128xf32>
    %cst_13 = arith.constant 0.000000e+00 : f32
    %131 = vector.broadcast %cst_13 : f32 to vector<8x128xf32>
    %132 = arith.maximumf %130, %131 : vector<8x128xf32>
    %133 = vector.broadcast %123 : f32 to vector<8x128xf32>
    %134 = arith.mulf %132, %133 : vector<8x128xf32>
    %135 = arith.addf %119, %134 : vector<8x128xf32>
    %c16 = arith.constant 16 : index
    %136 = memref.load %arg1[%c16] : memref<41xf32, #tpu.memory_space<smem>>
    %c17 = arith.constant 17 : index
    %137 = memref.load %arg1[%c17] : memref<41xf32, #tpu.memory_space<smem>>
    %c28 = arith.constant 28 : index
    %138 = memref.load %arg1[%c28] : memref<41xf32, #tpu.memory_space<smem>>
    %c38 = arith.constant 38 : index
    %139 = memref.load %arg1[%c38] : memref<41xf32, #tpu.memory_space<smem>>
    %140 = vector.broadcast %136 : f32 to vector<8x128xf32>
    %141 = arith.mulf %1, %140 : vector<8x128xf32>
    %142 = vector.broadcast %137 : f32 to vector<8x128xf32>
    %143 = arith.mulf %3, %142 : vector<8x128xf32>
    %144 = arith.addf %141, %143 : vector<8x128xf32>
    %145 = vector.broadcast %138 : f32 to vector<8x128xf32>
    %146 = arith.addf %144, %145 : vector<8x128xf32>
    %cst_14 = arith.constant 0.000000e+00 : f32
    %147 = vector.broadcast %cst_14 : f32 to vector<8x128xf32>
    %148 = arith.maximumf %146, %147 : vector<8x128xf32>
    %149 = vector.broadcast %139 : f32 to vector<8x128xf32>
    %150 = arith.mulf %148, %149 : vector<8x128xf32>
    %151 = arith.addf %135, %150 : vector<8x128xf32>
    %c18 = arith.constant 18 : index
    %152 = memref.load %arg1[%c18] : memref<41xf32, #tpu.memory_space<smem>>
    %c19 = arith.constant 19 : index
    %153 = memref.load %arg1[%c19] : memref<41xf32, #tpu.memory_space<smem>>
    %c29 = arith.constant 29 : index
    %154 = memref.load %arg1[%c29] : memref<41xf32, #tpu.memory_space<smem>>
    %c39 = arith.constant 39 : index
    %155 = memref.load %arg1[%c39] : memref<41xf32, #tpu.memory_space<smem>>
    %156 = vector.broadcast %152 : f32 to vector<8x128xf32>
    %157 = arith.mulf %1, %156 : vector<8x128xf32>
    %158 = vector.broadcast %153 : f32 to vector<8x128xf32>
    %159 = arith.mulf %3, %158 : vector<8x128xf32>
    %160 = arith.addf %157, %159 : vector<8x128xf32>
    %161 = vector.broadcast %154 : f32 to vector<8x128xf32>
    %162 = arith.addf %160, %161 : vector<8x128xf32>
    %cst_15 = arith.constant 0.000000e+00 : f32
    %163 = vector.broadcast %cst_15 : f32 to vector<8x128xf32>
    %164 = arith.maximumf %162, %163 : vector<8x128xf32>
    %165 = vector.broadcast %155 : f32 to vector<8x128xf32>
    %166 = arith.mulf %164, %165 : vector<8x128xf32>
    %167 = arith.addf %151, %166 : vector<8x128xf32>
    %c0_16 = arith.constant 0 : index
    %c0_17 = arith.constant 0 : index
    %168 = vector.load %arg3[%c0_16, %c0_17] : memref<8x128xf32, #tpu.memory_space<vmem>>, vector<8x128xf32>
    tpu.vector_store %arg3[%c0_16, %c0_17], %167 {strides = array<i32>} : memref<8x128xf32, #tpu.memory_space<vmem>>, vector<8x128xf32>,
    return
  }
  func.func @transform_0(%arg0: i32) -> i32 {
    %c0_i32 = arith.constant 0 : i32
    %c0_i32_0 = arith.constant 0 : i32
    return %c0_i32 : i32
  }
  func.func @transform_1(%arg0: i32) -> (i32, i32, i32) {
    %c0_i32 = arith.constant 0 : i32
    %c0_i32_0 = arith.constant 0 : i32
    %c0_i32_1 = arith.constant 0 : i32
    return %c0_i32, %arg0, %c0_i32_0 : i32, i32, i32
  }
  func.func @transform_2(%arg0: i32) -> (i32, i32) {
    %c0_i32 = arith.constant 0 : i32
    %c0_i32_0 = arith.constant 0 : i32
    return %arg0, %c0_i32 : i32, i32
  }
}

</mosaic_0001>

<bundles_post_ra>
// kernel: tpu_custom_call.1
= control target key start
LH: loop header
LB: loop body
LE: loop exit
PB: predicated region body
PF: predicated region fallthrough
CT: control target
= control target key end

     0   :  { %7 = vsyncpa [#allocation5], 0  ;;  %s500_s0 = inlined_call_operand.hbm [shape: f32[41], index: 0, kind: input, shape index: {}]   ;;  %s501_s1 = inlined_call_operand.hbm [shape: f32[2,8,128], index: 1, kind: input, shape index: {}]   ;;  %s502_s2 = inlined_call_operand.hbm [shape: f32[8,128], index: 2, kind: output, shape index: {}]  }
   0x1   :  { %8 = vsyncpa [#allocation3], 0 }
   0x2   :  { %9 = vsyncpa [#allocation4], 0  ;;  %s255_s11 = scalar_lea.hbm %s500_s0, 16 }
   0x3   :  { %p256_p0 = scmp.ne.s32.totalorder %s500_s0, %s255_s11  ;;  %p259_p1 = scmp.lt.u32.totalorder %s255_s11, %s500_s0 }
   0x5   :  { %p261_p2 = pnand %p259_p1, %p256_p0 }
   0x7   :  { %264 = shalt.err (!%p261_p2)
}
   0x8   :  { %s315_s16 = smov [#allocation2]   ;;  %s316_s19 = smov [#allocation6]  }
   0x9   :  { %17 = dma.hbm_to_smem %s500_s0, 16, %s315_s16, [#allocation5]  }
   0xa   :  { %s23_s20 = sshll.u32 %s316_s19, 4  ;;  %s265_s23 = scalar_lea.hbm %s501_s1, 256  ;;  %s24_s20 = int_to_ptr.vmem [resolvable:$true] %s23_s20 }
   0xb   :  { %p266_p3 = scmp.ne.s32.totalorder %s501_s1, %s265_s23  ;;  %p269_p4 = scmp.lt.u32.totalorder %s265_s23, %s501_s1 }
   0xd   :  { %p271_p5 = pnand %p269_p4, %p266_p3 }
   0xf   :  { %274 = shalt.err (!%p271_p5)
}
  0x10   :  { %s275_s28 = scalar_lea.vmem %s24_s20, 256  ;;  %p280_p7 = scmp.lt.s32.totalorder %s24_s20, %s24_s20 }
  0x11   :  { %p276_p6 = scmp.ne.s32.totalorder %s24_s20, %s275_s28  ;;  %p281_p8 = scmp.lt.s32.totalorder %s275_s28, %s275_s28 }
  0x13   :  { %p282_p9 = por %p281_p8, %p280_p7 }
  0x15   :  { %p283_p10 = pnand %p282_p9, %p276_p6 }
  0x17   :  { %286 = shalt.err (!%p283_p10)
}
  0x18   :  { %s317_s0 = smov 128   ;;  %s318_s29 = smov 8  }
  0x19   :  { %29 = dma.hbm_to_vmem [thread:$0]  %s501_s1, 256, %s24_s20, [#allocation3], %s317_s0, %s317_s0, %s318_s29  }
  0x1a   :  { %309 = dma.done.wait [#allocation5], 16  }
  0x1b   :  { %310 = vsyncadd [#allocation5], 4294967280 }
  0x1c   :  { %311 = dma.done.wait [#allocation3], 256  }
  0x1d   :  { %312 = vsyncadd [#allocation3], 4294967040 }
  0x1e   :  { %36 = sfence }
  0x1f   :  { %s359_s4 = sld [smem:[#allocation2 + $0x28]]  ;;  %s211_s6 = sld [smem:[#allocation2 + $0x1]]  ;;  %v367_v0 = vld [vmem:[#allocation6] sm:$0xff]  ;;  %v371_v1 = vld [vmem:[#allocation6 + $0x8] sm:$0xff] }
  0x20   :  { %s43_s5 = sld [smem:[#allocation2]]  ;;  %s361_s7 = sld [smem:[#allocation2 + $0x14]] }
  0x21   :  { %s363_s8 = sld [smem:[#allocation2 + $0x1e]]  ;;  %s214_s9 = sld [smem:[#allocation2 + $0x2]] }
  0x22   :  { %s215_s10 = sld [smem:[#allocation2 + $0x3]]  ;;  %s365_s11 = sld [smem:[#allocation2 + $0x15]] }
  0x23   :  { %s369_s1 = sld [smem:[#allocation2 + $0x1f]]  ;;  %s218_s12 = sld [smem:[#allocation2 + $0x4]] }
  0x24   :  { %s373_s13 = sld [smem:[#allocation2 + $0x5]]  ;;  %s375_s14 = sld [smem:[#allocation2 + $0x16]] }
  0x25   :  { %s377_s15 = sld [smem:[#allocation2 + $0x20]]  ;;  %s379_s16 = sld [smem:[#allocation2 + $0x6]]  ;;  %v49_v4 = vstv %s211_s6  ;;  %v41_v10 = vstv %s359_s4 }
  0x26   :  { %v47_v2 = vstv %s43_s5  ;;  %s382_s17 = sld [smem:[#allocation2 + $0x7]]  ;;  %v50_v5 = vmul.f32 %v49_v4, %v371_v1  ;;  %s387_s19 = sld [smem:[#allocation2 + $0x21]]  ;;  %v52_v7 = vstv %s361_s7 }
  0x27   :  { %v48_v3 = vmul.f32 %v47_v2, %v367_v0  ;;  %s384_s18 = sld [smem:[#allocation2 + $0x17]]  ;;  %v62_v6 = vstv %s214_s9  ;;  %s389_s20 = sld [smem:[#allocation2 + $0x8]]  ;;  %v55_v14 = vstv %s363_s8 }
  0x28   :  { %v63_v8 = vmul.f32 %v62_v6, %v367_v0  ;;  %v64_v9 = vstv %s215_s10  ;;  %s393_s21 = sld [smem:[#allocation2 + $0x9]]  ;;  %s395_s22 = sld [smem:[#allocation2 + $0x18]]  ;;  %v67_v15 = vstv %s365_s11 }
  0x29   :  { %v51_v11 = vadd.f32 %v50_v5, %v48_v3  ;;  %v65_v12 = vmul.f32 %v64_v9, %v371_v1  ;;  %v77_v13 = vstv %s218_s12  ;;  %s399_s23 = sld [smem:[#allocation2 + $0xa]]  ;;  %s405_s24 = sld [smem:[#allocation2 + $0xb]]  ;;  %v70_v20 = vstv %s369_s1 }
  0x2a   :  { %v78_v16 = vmul.f32 %v77_v13, %v367_v0  ;;  %v79_v17 = vstv %s373_s13  ;;  %s409_s25 = sld [smem:[#allocation2 + $0x22]]  ;;  %v82_v22 = vstv %s375_s14  ;;  %s415_s26 = sld [smem:[#allocation2 + $0x19]] }
  0x2b   :  { %v53_v18 = vadd.f32 %v52_v7, %v51_v11  ;;  %v66_v19 = vadd.f32 %v65_v12, %v63_v8  ;;  %v80_v21 = vmul.f32 %v79_v17, %v371_v1  ;;  %v85_v23 = vstv %s377_s15  ;;  %s417_s27 = sld [smem:[#allocation2 + $0xc]]  ;;  %s420_s28 = sld [smem:[#allocation2 + $0xd]] }
  0x2c   :  { %v92_v24 = vstv %s379_s16  ;;  %v94_v25 = vstv %s382_s17  ;;  %s426_s0 = sld [smem:[#allocation2 + $0x23]]  ;;  %s428_s29 = sld [smem:[#allocation2 + $0x1a]]  ;;  %v100_v39 = vstv %s387_s19 }
  0x2d   :  { %v54_v26 = vmax.f32 %v53_v18, 0.0  ;;  %v68_v27 = vadd.f32 %v67_v15, %v66_v19  ;;  %v81_v28 = vadd.f32 %v80_v21, %v78_v16  ;;  %v93_v29 = vmul.f32 %v92_v24, %v367_v0  ;;  %s431_s30 = sld [smem:[#allocation2 + $0xe]]  ;;  %s433_s3 = sld [smem:[#allocation2 + $0xf]] }
  0x2e   :  { %v95_v30 = vmul.f32 %v94_v25, %v371_v1  ;;  %v97_v31 = vstv %s384_s18  ;;  %v107_v32 = vstv %s389_s20  ;;  %v109_v33 = vstv %s393_s21  ;;  %s439_s4 = sld [smem:[#allocation2 + $0x24]]  ;;  %s441_s5 = sld [smem:[#allocation2 + $0x1b]] }
  0x2f   :  { %v56_v34 = vmul.f32 %v55_v14, %v54_v26  ;;  %v69_v35 = vmax.f32 %v68_v27, 0.0  ;;  %v83_v36 = vadd.f32 %v82_v22, %v81_v28  ;;  %v108_v37 = vmul.f32 %v107_v32, %v367_v0  ;;  %s445_s6 = sld [smem:[#allocation2 + $0x10]]  ;;  %s447_s7 = sld [smem:[#allocation2 + $0x11]] }
  0x30   :  { %v96_v38 = vadd.f32 %v95_v30, %v93_v29  ;;  %v110_v40 = vmul.f32 %v109_v33, %v371_v1  ;;  %v112_v41 = vstv %s395_s22  ;;  %v122_v45 = vstv %s399_s23  ;;  %s453_s8 = sld [smem:[#allocation2 + $0x1c]]  ;;  %s455_s9 = sld [smem:[#allocation2 + $0x12]] }
  0x31   :  { %v57_v42 = vadd.f32 %v56_v34, %v41_v10  ;;  %v71_v43 = vmul.f32 %v70_v20, %v69_v35  ;;  %v84_v44 = vmax.f32 %v83_v36, 0.0  ;;  %v123_v48 = vmul.f32 %v122_v45, %v367_v0  ;;  %s461_s10 = sld [smem:[#allocation2 + $0x25]]  ;;  %s463_s11 = sld [smem:[#allocation2 + $0x13]] }
  0x32   :  { %v98_v46 = vadd.f32 %v97_v31, %v96_v38  ;;  %v111_v47 = vadd.f32 %v110_v40, %v108_v37  ;;  %v124_v49 = vstv %s405_s24  ;;  %v115_v52 = vstv %s409_s25  ;;  %s469_s1 = sld [smem:[#allocation2 + $0x26]]  ;;  %s471_s12 = sld [smem:[#allocation2 + $0x1d]] }
  0x33   :  { %v72_v50 = vadd.f32 %v71_v43, %v57_v42  ;;  %v86_v51 = vmul.f32 %v85_v23, %v84_v44  ;;  %v125_v53 = vmul.f32 %v124_v49, %v371_v1  ;;  %v127_v56 = vstv %s415_s26  ;;  %s249_s13 = sld [smem:[#allocation2 + $0x27]]  ;;  %s319_s14 = smov [#allocation7]  }
  0x34   :  { %v99_v54 = vmax.f32 %v98_v46, 0.0  ;;  %v113_v55 = vadd.f32 %v112_v41, %v111_v47  ;;  %v137_v57 = vstv %s417_s27  ;;  %v139_v61 = vstv %s420_s28  ;;  %s200_s15 = sshll.u32 %s319_s14, 4  ;;  %s201_s15 = int_to_ptr.vmem [resolvable:$true] %s200_s15 }
  0x35   :  { %v87_v58 = vadd.f32 %v86_v51, %v72_v50  ;;  %v126_v59 = vadd.f32 %v125_v53, %v123_v48  ;;  %v138_v60 = vmul.f32 %v137_v57, %v367_v0  ;;  %v130_v2 = vstv %s426_s0  ;;  %s287_s16 = scalar_lea.vmem %s201_s15, 128  ;;  %p292_p12 = scmp.lt.s32.totalorder %s201_s15, %s201_s15 }
  0x36   :  { %v101_v62 = vmul.f32 %v100_v39, %v99_v54  ;;  %v114_v63 = vmax.f32 %v113_v55, 0.0  ;;  %v140_v3 = vmul.f32 %v139_v61, %v371_v1  ;;  %v142_v5 = vstv %s428_s29  ;;  %p288_p11 = scmp.ne.s32.totalorder %s201_s15, %s287_s16  ;;  %p293_p13 = scmp.lt.s32.totalorder %s287_s16, %s287_s16 }
  0x37   :  { %v128_v4 = vadd.f32 %v127_v56, %v126_v59  ;;  %v152_v6 = vstv %s431_s30  ;;  %v154_v7 = vstv %s433_s3  ;;  %v145_v13 = vstv %s439_s4 }
  0x38   :  { %v102_v8 = vadd.f32 %v101_v62, %v87_v58  ;;  %v116_v9 = vmul.f32 %v115_v52, %v114_v63  ;;  %v141_v10 = vadd.f32 %v140_v3, %v138_v60  ;;  %v153_v11 = vmul.f32 %v152_v6, %v367_v0  ;;  %p294_p0 = por %p293_p13, %p292_p12 }
  0x39   :  { %v129_v12 = vmax.f32 %v128_v4, 0.0  ;;  %v155_v14 = vmul.f32 %v154_v7, %v371_v1  ;;  %v157_v15 = vstv %s441_s5  ;;  %v167_v18 = vstv %s445_s6 }
  0x3a   :  { %v117_v16 = vadd.f32 %v116_v9, %v102_v8  ;;  %v143_v17 = vadd.f32 %v142_v5, %v141_v10  ;;  %v169_v19 = vstv %s447_s7  ;;  %v168_v22 = vmul.f32 %v167_v18, %v367_v0  ;;  %p295_p1 = pnand %p294_p0, %p288_p11 }
  0x3b   :  { %v131_v20 = vmul.f32 %v130_v2, %v129_v12  ;;  %v156_v21 = vadd.f32 %v155_v14, %v153_v11  ;;  %v170_v23 = vmul.f32 %v169_v19, %v371_v1  ;;  %v172_v25 = vstv %s453_s8 }
  0x3c   :  { %v144_v24 = vmax.f32 %v143_v17, 0.0  ;;  %v182_v26 = vstv %s455_s9  ;;  %v160_v32 = vstv %s461_s10  ;;  %v184_v33 = vstv %s463_s11 }
  0x3d   :  { %v132_v27 = vadd.f32 %v131_v20, %v117_v16  ;;  %v158_v28 = vadd.f32 %v157_v15, %v156_v21  ;;  %v171_v29 = vadd.f32 %v170_v23, %v168_v22  ;;  %v183_v30 = vmul.f32 %v182_v26, %v367_v0 }
  0x3e   :  { %v146_v31 = vmul.f32 %v145_v13, %v144_v24  ;;  %v185_v36 = vmul.f32 %v184_v33, %v371_v1  ;;  %v175_v38 = vstv %s469_s1  ;;  %v187_v39 = vstv %s471_s12 }
  0x3f   :  { %v159_v34 = vmax.f32 %v158_v28, 0.0  ;;  %v173_v35 = vadd.f32 %v172_v25, %v171_v29  ;;  %v190_v46 = vstv %s249_s13 }
  0x40   :  { %v147_v37 = vadd.f32 %v146_v31, %v132_v27  ;;  %v186_v42 = vadd.f32 %v185_v36, %v183_v30 }
  0x41   :  { %v161_v40 = vmul.f32 %v160_v32, %v159_v34  ;;  %v174_v41 = vmax.f32 %v173_v35, 0.0 }
  0x42   :  { %v188_v45 = vadd.f32 %v187_v39, %v186_v42 }
  0x43   :  { %v162_v43 = vadd.f32 %v161_v40, %v147_v37  ;;  %v176_v44 = vmul.f32 %v175_v38, %v174_v41 }
  0x44   :  { %v189_v48 = vmax.f32 %v188_v45, 0.0 }
  0x45   :  { %v177_v47 = vadd.f32 %v176_v44, %v162_v43 }
  0x46   :  { %v191_v0 = vmul.f32 %v190_v46, %v189_v48 }
  0x48   :  { %v192_v49 = vadd.f32 %v191_v0, %v177_v47 }
  0x4a   :  { %193 = vst [vmem:[#allocation7] sm:$0xff] %v192_v49 }
  0x4b   :  { %298 = shalt.err (!%p295_p1)
}
  0x4c   :  { %s299_s19 = scalar_lea.hbm %s502_s2, 128 }
  0x4d   :  { %p300_p2 = scmp.ne.s32.totalorder %s502_s2, %s299_s19  ;;  %p303_p3 = scmp.lt.u32.totalorder %s299_s19, %s502_s2 }
  0x4f   :  { %p305_p4 = pnand %p303_p3, %p300_p2 }
  0x51   :  { %308 = shalt.err (!%p305_p4)
}
  0x52   :  { %203 = dma.vmem_to_hbm [thread:$0]  %s201_s15, 128, %s502_s2, [#allocation4]  }
  0x53   :  { %313 = dma.done.wait [#allocation4], 128  }
  0x54   :  { %314 = vsyncadd [#allocation4], 4294967168 }
  0x55   :  { %207 = vsyncpa [#allocation3], 1 }
  0x56   :  { %208 = vsyncpa [#allocation4], 1 }
  0x57   :  { %209 = vsyncpa [#allocation5], 1 }

</bundles_post_ra>
